<compile_context>
chip_gen: v7x
topology: tpu7x:2x2x1
jax: 0.10.0
libtpu: 0.0.40
codegen_flags: <defaults>
</compile_context>

<pallas_src>
import jax
import jax.numpy as jnp
from jax.experimental import pallas as pl
from jax.experimental.pallas import tpu as pltpu


def _round_up(x, m):
    return ((x + m - 1) // m) * m


def prepare_copy_network_params(params, *, copy_num):
    """One-time parameter prep (call at load time, not per forward).

    Builds the block-diagonal fused weight
        rows 0..D-1,  cols 0..tgt_num-1 : W_gen
        rows D..2D-1, col  tgt_num      : W_copy   (the copy-gate column)
        everything else                 : 0
    padded so that both the generator block (tgt_pad) and the copy block
    (copy_pad) are multiples of 128 lanes.  Weight is stored in bf16 once.
    """
    D, tgt_num = params["W_gen"].shape
    tgt_pad = _round_up(tgt_num + 1, 128)    # +1 reserves a lane for the gate
    copy_pad = _round_up(copy_num, 128)

    w_fused = jnp.zeros((2 * D, tgt_pad), jnp.float32)
    w_fused = w_fused.at[:D, :tgt_num].set(params["W_gen"])
    w_fused = w_fused.at[D:, tgt_num].set(params["W_copy"][:, 0])

    b_fused = jnp.zeros((1, tgt_pad), jnp.float32)
    b_fused = b_fused.at[:, :tgt_num].set(params["b_gen"])
    b_fused = b_fused.at[:, tgt_num].set(params["b_copy"][0, 0])

    return {
        "w_fused": w_fused.astype(jnp.bfloat16),   # (2D, tgt_pad) bf16, built once
        "b_fused": b_fused,                        # (1, tgt_pad) f32 (added post-MXU)
        "D": D, "tgt_num": tgt_num, "copy_num": copy_num,
        "tgt_pad": tgt_pad, "copy_pad": copy_pad,
    }


def copy_network_forward(raw_decoder_hidden, out_decoder_hidden, scores,
                         copy_to_ext, prepared, *, unk_idx, block_t=None):
    """Batch-major CopyNetwork forward.

        raw_decoder_hidden, out_decoder_hidden : (batch, tlen, D)  float32
        scores                                 : (batch, tlen, src)
        copy_to_ext                            : (batch, src) int32
    Returns:
        all_output_probs : (batch, tlen, tgt_num + copy_num)
        copy_scores      : (batch, tlen, 1)

    (Callers holding PyTorch-convention time-major tensors should transpose
    once at the boundary — or better, produce batch-major upstream.  Callers
    that can consume the padded [gen_pad | copy_pad] layout directly can skip
    the strip at the end and avoid one pass over the output.)
    """
    batch, tlen, D = raw_decoder_hidden.shape
    src = scores.shape[2]
    tgt_num = prepared["tgt_num"]
    copy_num = prepared["copy_num"]
    tgt_pad = prepared["tgt_pad"]
    copy_pad = prepared["copy_pad"]
    assert prepared["D"] == D
    Vp = tgt_pad + copy_pad
    gate_col = tgt_num                     # reserved lane inside the padded gen block

    # --- row tiling: big tiles amortize the ~0.35us per-grid-step overhead ---
    if block_t is None:
        block_t = min(tlen, 512)
    if block_t < tlen:
        block_t = max(8, (block_t // 8) * 8)
    grid = (batch, pl.cdiv(tlen, block_t))

    if scores.dtype != jnp.float32:
        scores = scores.astype(jnp.float32)

    # Per-batch source-token scatter matrix (== PyTorch onehot(copy_to_ext,
    # N=copy_num, ignore_index=UNK)), padded to copy_pad and stored as bf16
    # (0/1 are exact in bf16; halves its HBM/VMEM footprint).
    oneh = jax.nn.one_hot(copy_to_ext, copy_pad, dtype=jnp.bfloat16)
    oneh = oneh * (copy_to_ext != unk_idx).astype(jnp.bfloat16)[..., None]  # (batch, src, copy_pad)

    # --- VMEM budget: 2x every block (double buffering) + slack, capped to the
    # actual device VMEM so the same config is valid on v5e/v6e/v7x. ---
    per_block = (2 * block_t * D * 4          # out_h + raw_h tiles (f32)
                 + block_t * src * 4          # scores tile (f32)
                 + src * copy_pad * 2         # one-hot block (bf16)
                 + 2 * D * tgt_pad * 2        # fused weight (bf16)
                 + tgt_pad * 4                # fused bias (f32)
                 + block_t * Vp * 4)          # padded output tile (f32)
    needed = 2 * per_block + (2 << 20)
    try:
        vmem_cap = int(getattr(pltpu.get_tpu_info(), "vmem_capacity_bytes", 128 << 20))
    except Exception:
        vmem_cap = 64 << 20
    vmem_limit = max(16 << 20, min(needed, int(0.8 * vmem_cap)))

    def kernel(out_h_ref, raw_h_ref, scores_ref, oneh_ref, wf_ref, bf_ref, all_ref):
        # In-kernel bf16 cast of the activations (no wrapper-side convert op).
        # Concat is done in f32 (proven lowering path), then cast once.
        x = jnp.concatenate([out_h_ref[0], raw_h_ref[0]], axis=-1)      # (TT, 2D) f32
        x = x.astype(jnp.bfloat16)

        # Single fused MXU call, K = 2D: [gen logits | gate logit | pad].
        y = jnp.dot(x, wf_ref[...],
                    preferred_element_type=jnp.float32) + bf_ref[...]   # (TT, tgt_pad) f32

        col = jax.lax.broadcasted_iota(jnp.int32, y.shape, 1)

        # ---- copy gate: sigmoid of the dedicated gate column ----
        gate_logit = jnp.sum(jnp.where(col == gate_col, y, 0.0),
                             axis=-1, keepdims=True)                    # (TT, 1)
        gate = jax.nn.sigmoid(gate_logit)

        # ---- generator LogSoftmax over the valid tgt columns only ----
        masked = jnp.where(col < tgt_num, y, -1e30)
        m = jnp.max(masked, axis=-1, keepdims=True)
        z = masked - m
        lse = jnp.log(jnp.sum(jnp.exp(z), axis=-1, keepdims=True))
        gen_log = z - lse                                               # (TT, tgt_pad)
        # Stash the gate into its reserved lane (no separate lane-sparse store).
        gen_out = jnp.where(col == gate_col, gate, gen_log)

        # ---- copy distribution: (scores * gate) @ onehot(copy_to_ext) ----
        # scores kept in f32 so copy_log keeps full log-domain accuracy;
        # the bf16 one-hot upcast is exact.
        sc = scores_ref[0] * gate                                       # (TT, src) f32
        copy_probs = jnp.dot(sc, oneh_ref[0].astype(jnp.float32),
                             preferred_element_type=jnp.float32)        # (TT, copy_pad)
        copy_log = jnp.log(jnp.clip(copy_probs, 1e-6, 1.0 - 1e-6))

        # ---- single lane-dense store (tgt_pad, copy_pad multiples of 128) ----
        all_ref[0] = jnp.concatenate([gen_out, copy_log], axis=-1)      # (TT, Vp)

    padded = pl.pallas_call(
        kernel,
        out_shape=jax.ShapeDtypeStruct((batch, tlen, Vp), jnp.float32),
        grid=grid,
        in_specs=[
            pl.BlockSpec((1, block_t, D), lambda b, t: (b, t, 0)),       # out_decoder_hidden
            pl.BlockSpec((1, block_t, D), lambda b, t: (b, t, 0)),       # raw_decoder_hidden
            pl.BlockSpec((1, block_t, src), lambda b, t: (b, t, 0)),     # attention scores
            pl.BlockSpec((1, src, copy_pad), lambda b, t: (b, 0, 0)),    # per-batch one-hot (bf16)
            pl.BlockSpec((2 * D, tgt_pad), lambda b, t: (0, 0)),         # fused weight (bf16)
            pl.BlockSpec((1, tgt_pad), lambda b, t: (0, 0)),             # fused bias (f32)
        ],
        out_specs=pl.BlockSpec((1, block_t, Vp), lambda b, t: (b, t, 0)),
        compiler_params=pltpu.CompilerParams(
            dimension_semantics=("parallel", "parallel"),
            vmem_limit_bytes=vmem_limit),
    )(out_decoder_hidden, raw_decoder_hidden, scores,
      oneh, prepared["w_fused"], prepared["b_fused"])

    # Strip the pad columns / extract the gate lane (tiny XLA slices; callers
    # that accept the padded layout can skip this).
    copy_scores = padded[:, :, gate_col:gate_col + 1]                    # (batch, tlen, 1)
    all_output = jnp.concatenate(
        [padded[:, :, :tgt_num], padded[:, :, tgt_pad:tgt_pad + copy_num]], axis=-1)
    return all_output, copy_scores


def reference_forward(raw, out_h, scores, copy_to_ext, params, *, copy_num, unk_idx):
    """Pure-JAX batch-major reference mirroring the PyTorch forward and the
    kernel's matmul precision (bf16 operands for the Linear layers, f32 accum;
    f32 scores and exact-bf16 one-hot for the copy matmul)."""
    bf16 = jnp.bfloat16
    logits = jnp.dot(out_h.astype(bf16), params["W_gen"].astype(bf16),
                     preferred_element_type=jnp.float32) + params["b_gen"][0]
    gen_log = jax.nn.log_softmax(logits, axis=-1)
    cs = jax.nn.sigmoid(jnp.dot(raw.astype(bf16), params["W_copy"].astype(bf16),
                                preferred_element_type=jnp.float32) + params["b_copy"][0])
    sc = scores * cs
    oneh = jax.nn.one_hot(copy_to_ext, copy_num, dtype=jnp.float32)
    oneh = oneh * (copy_to_ext != unk_idx).astype(jnp.float32)[..., None]
    copy_probs = jnp.einsum("bts,bsc->btc", sc, oneh)
    copy_log = jnp.log(jnp.clip(copy_probs, 1e-6, 1.0 - 1e-6))
    return jnp.concatenate([gen_log, copy_log], axis=-1), cs


if __name__ == "__main__":
    # Small batch-major shapes consistent with the module's forward.
    batch, tlen, src = 4, 32, 24
    decoder_hidden_dim = 64
    encoder_hidden_dim = 64
    tgt_num = 48
    copy_num = 40
    unk_idx = 0   # fields['copy_to_ext'].vocab.stoi[UNK_WORD]

    key = jax.random.PRNGKey(0)
    ks = jax.random.split(key, 9)

    # deterministic parameter init (PyTorch-Linear-like uniform scaling)
    bound = 1.0 / jnp.sqrt(decoder_hidden_dim)
    params = {
        "W_gen": jax.random.uniform(ks[0], (decoder_hidden_dim, tgt_num),
                                    minval=-bound, maxval=bound, dtype=jnp.float32),
        "b_gen": jax.random.uniform(ks[1], (1, tgt_num),
                                    minval=-bound, maxval=bound, dtype=jnp.float32),
        "W_copy": jax.random.uniform(ks[2], (decoder_hidden_dim, 1),
                                     minval=-bound, maxval=bound, dtype=jnp.float32),
        "b_copy": jax.random.uniform(ks[3], (1, 1),
                                     minval=-bound, maxval=bound, dtype=jnp.float32),
    }

    raw_decoder_hidden = jax.random.normal(ks[4], (batch, tlen, decoder_hidden_dim), jnp.float32)
    out_decoder_hidden = jax.random.normal(ks[5], (batch, tlen, decoder_hidden_dim), jnp.float32)
    content = jax.random.normal(ks[6], (batch, tlen, encoder_hidden_dim), jnp.float32)  # shape-check only
    scores = jax.nn.softmax(jax.random.normal(ks[7], (batch, tlen, src), jnp.float32), axis=-1)
    copy_to_ext = jax.random.randint(ks[8], (batch, src), 0, copy_num, dtype=jnp.int32)

    # shape assertion mirroring the PyTorch forward
    assert raw_decoder_hidden.shape[:2] == content.shape[:2]

    # One-time parameter prep (fused block-diagonal bf16 weight + padded bias).
    prepared = prepare_copy_network_params(params, copy_num=copy_num)

    all_probs, copy_scores = copy_network_forward(
        raw_decoder_hidden, out_decoder_hidden, scores, copy_to_ext, prepared,
        unk_idx=unk_idx)            # default block_t = min(tlen, 512)
    jax.block_until_ready((all_probs, copy_scores))

    ref_all, ref_cs = reference_forward(
        raw_decoder_hidden, out_decoder_hidden, scores, copy_to_ext, params,
        copy_num=copy_num, unk_idx=unk_idx)

    assert all_probs.shape == (batch, tlen, tgt_num + copy_num)
    assert copy_scores.shape == (batch, tlen, 1)
    assert jnp.allclose(all_probs, ref_all, atol=1e-4, rtol=1e-4)
    assert jnp.allclose(copy_scores, ref_cs, atol=1e-4, rtol=1e-4)

    print("KERNEL_OK")
</pallas_src>

<mosaic_0001>
module attributes {stable_mosaic.version = 11 : i64} {
  func.func @kernel(%arg0: i32, %arg1: i32, %arg2: memref<1x32x64xf32, #tpu.memory_space<vmem>>, %arg3: memref<1x32x64xf32, #tpu.memory_space<vmem>>, %arg4: memref<1x32x24xf32, #tpu.memory_space<vmem>>, %arg5: memref<1x24x128xbf16, #tpu.memory_space<vmem>>, %arg6: memref<128x128xbf16, #tpu.memory_space<vmem>>, %arg7: memref<1x128xf32, #tpu.memory_space<vmem>>, %arg8: memref<1x32x256xf32, #tpu.memory_space<vmem>>) attributes {dimension_semantics = [#tpu.dimension_semantics<parallel>, #tpu.dimension_semantics<parallel>], iteration_bounds = array<i64: 4, 1>, scalar_prefetch = 0 : i64, scratch_operands = 0 : i64, tpu.core_type = #tpu.core_type<tc>, window_params = [{transform_indices = @transform_0, window_bounds = array<i64: 1, 32, 64>}, {transform_indices = @transform_1, window_bounds = array<i64: 1, 32, 64>}, {transform_indices = @transform_2, window_bounds = array<i64: 1, 32, 24>}, {transform_indices = @transform_3, window_bounds = array<i64: 1, 24, 128>}, {pipeline_mode = #tpu.pipeline_mode<synchronous>, transform_indices = @transform_4, window_bounds = array<i64: 128, 128>}, {pipeline_mode = #tpu.pipeline_mode<synchronous>, transform_indices = @transform_5, window_bounds = array<i64: 1, 128>}, {transform_indices = @transform_6, window_bounds = array<i64: 1, 32, 256>}]} {
    %c0 = arith.constant 0 : index
    %c0_0 = arith.constant 0 : index
    %c0_1 = arith.constant 0 : index
    %0 = vector.load %arg2[%c0, %c0_0, %c0_1] : memref<1x32x64xf32, #tpu.memory_space<vmem>>, vector<1x32x64xf32>
    %1 = vector.shape_cast %0 : vector<1x32x64xf32> to vector<32x64xf32>
    %c0_2 = arith.constant 0 : index
    %c0_3 = arith.constant 0 : index
    %c0_4 = arith.constant 0 : index
    %2 = vector.load %arg3[%c0_2, %c0_3, %c0_4] : memref<1x32x64xf32, #tpu.memory_space<vmem>>, vector<1x32x64xf32>
    %3 = vector.shape_cast %2 : vector<1x32x64xf32> to vector<32x64xf32>
    %4 = tpu.concatenate %1, %3 in 1 : vector<32x64xf32>, vector<32x64xf32> -> vector<32x128xf32>
    %5 = arith.truncf %4 : vector<32x128xf32> to vector<32x128xbf16>
    %c0_5 = arith.constant 0 : index
    %c0_6 = arith.constant 0 : index
    %6 = vector.load %arg6[%c0_5, %c0_6] : memref<128x128xbf16, #tpu.memory_space<vmem>>, vector<128x128xbf16>
    %cst = arith.constant dense<0.000000e+00> : vector<32x128xf32>
    %7 = tpu.matmul %5, %6, %cst {dimension_numbers = #tpu.dot_dimension_numbers<[1], [0], [0], [1], [0, 0, 1, 1], [], []>} : vector<32x128xbf16>, vector<128x128xbf16>, vector<32x128xf32> -> vector<32x128xf32>
    %c0_7 = arith.constant 0 : index
    %c0_8 = arith.constant 0 : index
    %8 = vector.load %arg7[%c0_7, %c0_8] : memref<1x128xf32, #tpu.memory_space<vmem>>, vector<1x128xf32>
    %9 = vector.broadcast %8 : vector<1x128xf32> to vector<32x128xf32>
    %10 = arith.addf %7, %9 : vector<32x128xf32>
    %11 = tpu.iota {dimensions = array<i32: 1>} : vector<32x128xi32>
    %c48_i32 = arith.constant 48 : i32
    %12 = vector.broadcast %c48_i32 : i32 to vector<32x128xi32>
    %13 = arith.cmpi eq, %11, %12 : vector<32x128xi32>
    %cst_9 = arith.constant 0.000000e+00 : f32
    %14 = vector.broadcast %cst_9 : f32 to vector<32x128xf32>
    %15 = arith.select %13, %10, %14 : vector<32x128xi1>, vector<32x128xf32>
    %cst_10 = arith.constant dense<0.000000e+00> : vector<32xf32>
    %16 = vector.multi_reduction <add>, %15, %cst_10 [1] : vector<32x128xf32> to vector<32xf32>
    %17 = vector.shape_cast %16 : vector<32xf32> to vector<32x1xf32>
    %18 = arith.negf %17 : vector<32x1xf32>
    %19 = math.exp %18 : vector<32x1xf32>
    %cst_11 = arith.constant 1.000000e+00 : f32
    %20 = vector.broadcast %cst_11 : f32 to vector<32x1xf32>
    %21 = arith.addf %20, %19 : vector<32x1xf32>
    %22 = arith.divf %20, %21 : vector<32x1xf32>
    %c48_i32_12 = arith.constant 48 : i32
    %23 = vector.broadcast %c48_i32_12 : i32 to vector<32x128xi32>
    %24 = arith.cmpi slt, %11, %23 : vector<32x128xi32>
    %cst_13 = arith.constant -1.000000e+30 : f32
    %25 = vector.broadcast %cst_13 : f32 to vector<32x128xf32>
    %26 = arith.select %24, %10, %25 : vector<32x128xi1>, vector<32x128xf32>
    %cst_14 = arith.constant dense<0xFF800000> : vector<32xf32>
    %27 = vector.multi_reduction <maximumf>, %26, %cst_14 [1] : vector<32x128xf32> to vector<32xf32>
    %28 = vector.shape_cast %27 : vector<32xf32> to vector<32x1xf32>
    %29 = vector.broadcast %28 : vector<32x1xf32> to vector<32x128xf32>
    %30 = arith.subf %26, %29 : vector<32x128xf32>
    %31 = math.exp %30 : vector<32x128xf32>
    %cst_15 = arith.constant dense<0.000000e+00> : vector<32xf32>
    %32 = vector.multi_reduction <add>, %31, %cst_15 [1] : vector<32x128xf32> to vector<32xf32>
    %33 = vector.shape_cast %32 : vector<32xf32> to vector<32x1xf32>
    %34 = math.log %33 : vector<32x1xf32>
    %35 = vector.broadcast %34 : vector<32x1xf32> to vector<32x128xf32>
    %36 = arith.subf %30, %35 : vector<32x128xf32>
    %c48_i32_16 = arith.constant 48 : i32
    %37 = vector.broadcast %c48_i32_16 : i32 to vector<32x128xi32>
    %38 = arith.cmpi eq, %11, %37 : vector<32x128xi32>
    %39 = vector.shape_cast %22 : vector<32x1xf32> to vector<32x1xf32>
    %40 = vector.broadcast %39 : vector<32x1xf32> to vector<32x128xf32>
    %41 = arith.select %38, %40, %36 : vector<32x128xi1>, vector<32x128xf32>
    %c0_17 = arith.constant 0 : index
    %c0_18 = arith.constant 0 : index
    %c0_19 = arith.constant 0 : index
    %42 = vector.load %arg4[%c0_17, %c0_18, %c0_19] : memref<1x32x24xf32, #tpu.memory_space<vmem>>, vector<1x32x24xf32>
    %43 = vector.shape_cast %42 : vector<1x32x24xf32> to vector<32x24xf32>
    %44 = vector.broadcast %22 : vector<32x1xf32> to vector<32x24xf32>
    %45 = arith.mulf %43, %44 : vector<32x24xf32>
    %c0_20 = arith.constant 0 : index
    %c0_21 = arith.constant 0 : index
    %c0_22 = arith.constant 0 : index
    %46 = vector.load %arg5[%c0_20, %c0_21, %c0_22] : memref<1x24x128xbf16, #tpu.memory_space<vmem>>, vector<1x24x128xbf16>
    %47 = vector.shape_cast %46 : vector<1x24x128xbf16> to vector<24x128xbf16>
    %48 = arith.extf %47 : vector<24x128xbf16> to vector<24x128xf32>
    %cst_23 = arith.constant dense<0.000000e+00> : vector<32x128xf32>
    %49 = tpu.matmul %45, %48, %cst_23 {dimension_numbers = #tpu.dot_dimension_numbers<[1], [0], [0], [1], [0, 0, 1, 1], [], []>} : vector<32x24xf32>, vector<24x128xf32>, vector<32x128xf32> -> vector<32x128xf32>
    %cst_24 = arith.constant 9.99999997E-7 : f32
    %cst_25 = arith.constant 0.999998986 : f32
    %50 = vector.broadcast %cst_24 : f32 to vector<32x128xf32>
    %51 = arith.maximumf %50, %49 : vector<32x128xf32>
    %52 = vector.broadcast %cst_25 : f32 to vector<32x128xf32>
    %53 = arith.minimumf %52, %51 : vector<32x128xf32>
    %54 = math.log %53 : vector<32x128xf32>
    %55 = tpu.concatenate %41, %54 in 1 : vector<32x128xf32>, vector<32x128xf32> -> vector<32x256xf32>
    %c0_26 = arith.constant 0 : index
    %c0_27 = arith.constant 0 : index
    %c0_28 = arith.constant 0 : index
    %56 = vector.load %arg8[%c0_26, %c0_27, %c0_28] : memref<1x32x256xf32, #tpu.memory_space<vmem>>, vector<1x32x256xf32>
    %57 = vector.shape_cast %56 : vector<1x32x256xf32> to vector<32x256xf32>
    %58 = vector.shape_cast %55 : vector<32x256xf32> to vector<1x32x256xf32>
    tpu.vector_store %arg8[%c0_26, %c0_27, %c0_28], %58 {strides = array<i32>} : memref<1x32x256xf32, #tpu.memory_space<vmem>>, vector<1x32x256xf32>,
    return
  }
  func.func @transform_0(%arg0: i32, %arg1: i32) -> (i32, i32, i32) {
    %c0_i32 = arith.constant 0 : i32
    %c0_i32_0 = arith.constant 0 : i32
    return %arg0, %arg1, %c0_i32 : i32, i32, i32
  }
  func.func @transform_1(%arg0: i32, %arg1: i32) -> (i32, i32, i32) {
    %c0_i32 = arith.constant 0 : i32
    %c0_i32_0 = arith.constant 0 : i32
    return %arg0, %arg1, %c0_i32 : i32, i32, i32
  }
  func.func @transform_2(%arg0: i32, %arg1: i32) -> (i32, i32, i32) {
    %c0_i32 = arith.constant 0 : i32
    %c0_i32_0 = arith.constant 0 : i32
    return %arg0, %arg1, %c0_i32 : i32, i32, i32
  }
  func.func @transform_3(%arg0: i32, %arg1: i32) -> (i32, i32, i32) {
    %c0_i32 = arith.constant 0 : i32
    %c0_i32_0 = arith.constant 0 : i32
    %c0_i32_1 = arith.constant 0 : i32
    return %arg0, %c0_i32, %c0_i32_0 : i32, i32, i32
  }
  func.func @transform_4(%arg0: i32, %arg1: i32) -> (i32, i32) {
    %c0_i32 = arith.constant 0 : i32
    %c0_i32_0 = arith.constant 0 : i32
    %c0_i32_1 = arith.constant 0 : i32
    return %c0_i32, %c0_i32_0 : i32, i32
  }
  func.func @transform_5(%arg0: i32, %arg1: i32) -> (i32, i32) {
    %c0_i32 = arith.constant 0 : i32
    %c0_i32_0 = arith.constant 0 : i32
    %c0_i32_1 = arith.constant 0 : i32
    return %c0_i32, %c0_i32_0 : i32, i32
  }
  func.func @transform_6(%arg0: i32, %arg1: i32) -> (i32, i32, i32) {
    %c0_i32 = arith.constant 0 : i32
    %c0_i32_0 = arith.constant 0 : i32
    return %arg0, %arg1, %c0_i32 : i32, i32, i32
  }
}

</mosaic_0001>

<bundles_post_ra>
// kernel: tpu_custom_call.1
= control target key start
LH: loop header
LB: loop body
LE: loop exit
PB: predicated region body
PF: predicated region fallthrough
CT: control target
= control target key end

     0   :  { %s1680_s0 = inlined_call_operand.vmem [shape: f32[4,32,64], index: 0, kind: input, shape index: {}]   ;;  %s1681_s1 = inlined_call_operand.hbm [shape: f32[4,32,64], index: 1, kind: input, shape index: {}]   ;;  %s1682_s2 = inlined_call_operand.vmem [shape: f32[4,32,24], index: 2, kind: input, shape index: {}]   ;;  %s1683_s3 = inlined_call_operand.hbm [shape: bf16[4,24,128], index: 3, kind: input, shape index: {}]   ;;  %s1684_s4 = inlined_call_operand.vmem [shape: bf16[128,128], index: 4, kind: input, shape index: {}]   ;;  %s1685_s5 = inlined_call_operand.vmem [shape: f32[1,128], index: 5, kind: input, shape index: {}]   ;;  %s1686_s6 = inlined_call_operand.hbm [shape: f32[4,32,256], index: 6, kind: output, shape index: {}]  }
   0x1   :  { %1690 = sst [smem:[#allocation12_spill]] %s1681_s1 }
   0x2   :  { %11 = vsyncpa [#allocation3], 0 }
   0x3   :  { %13 = vsyncpa [#allocation3 + $0x1], 0 }
   0x4   :  { %14 = vsyncpa [#allocation6], 0 }
   0x5   :  { %16 = vsyncpa [#allocation6 + $0x1], 0 }
   0x6   :  { %17 = vsyncpa [#allocation4], 0 }
   0x7   :  { %19 = vsyncpa [#allocation4 + $0x1], 0  ;;  %s1367_s21 = smov 0   ;;  %s1369_s22 = smov 0  }
   0x8   :  { %s1371_s23 = smov 0   ;;  %s1373_s24 = smov 0  }
   0x9   :  { %s1375_s25 = smov 0   ;;  %s1377_s26 = smov 0  }
   0xa LB: > { %s941_s27 = sadd.s32 4294967295, %s1320_s26   ;;  %s942_s28 = sadd.s32 4294967294, %s1320_s26   ;;  %s1320_s26 = sphi %s1377_s26, %s25_s26   ;;  %s1316_s25 = sphi %s1375_s25, %s1708_s25   ;;  %s1312_s24 = sphi %s1373_s24, %s1707_s24   ;;  %s1308_s23 = sphi %s1371_s23, %s1706_s23   ;;  %s1304_s22 = sphi %s1369_s22, %s1705_s22   ;;  %s1300_s21 = sphi %s1367_s21, %s1704_s21  }
   0xb   : > { %s37_s29 = sadd.s32 1, %s1316_s25  ;;  %s74_s30 = sadd.s32 1, %s1308_s23 }
   0xc   : > { %p39_p0 = scmp.ge.s32.totalorder %s37_s29, 4  ;;  %p81_p1 = scmp.ne.s32.totalorder %s1308_s23, %s1304_s22 }
   0xd   : > { %p82_p2 = scmp.eq.s32.totalorder %s1320_s26, 0  ;;  %p87_p3 = scmp.ne.s32.totalorder %s1304_s22, %s1300_s21 }
   0xe   : > { %s1710_s29 = smov (%p39_p0, %s37_s29), 0  ;;  %p88_p5 = scmp.eq.s32.totalorder %s941_s27, 0 }
   0xf   : > { %1691 = sst [smem:[#allocation11_spill]] %s1710_s29  ;;  %p1408_p4 = por %p82_p2, %p81_p1 }
  0x10   : > { %s69_s8 = ssub.s32 %s1316_s25, %s1710_s29  ;;  %p209_p6 = scmp.eq.s32.totalorder %s941_s27, 3 }
  0x11   : > { %p72_p7 = scmp.eq.s32.totalorder %s69_s8, 0  ;;  %p1414_p8 = por %p88_p5, %p87_p3 }
  0x12   : > { %p1418_p9 = por %p209_p6, %p81_p1  ;;  %p215_p10 = scmp.eq.s32.totalorder %s942_s28, 3 }
  0x13   : > { %s1693_s9 = scalar_select %p1414_p8, 1, 0 }
  0x14   : > { %s1694_s10 = scalar_select %p1418_p9, 1, 0 }
  0x15   : > { %s1423_s11 = scalar_select %p72_p7, %s1308_s23, %s74_s30  }
  0x16   : > { %p1425_p11 = por %p215_p10, %p87_p3  ;;  %p1059_p12 = scmp.lt.s32.totalorder %s1320_s26, 4 }
  0x17   : > { %s1431_s13 = sand.u32 1, %s1308_s23   ;;  %s978_s15 = sshll.u32 %s1316_s25, 9 }
  0x18   : > { %s1695_s12 = scalar_select %p1425_p11, 1, 0 }
  0x19   : > { %s945_s14 = sshll.u32 %s1431_s13, 5  ;;  %s1696_s1 = sld [smem:[#allocation12_spill]] }
  0x1a   : > { %s258_s19 = scalar_lea.vmem [#allocation2], %s945_s14  ;;  %p1444_p13 = pnand %p1059_p12, %p1408_p4 }
  0x1b   : > { %s267_s20 = sshll.u32 %s258_s19, 4  ;;  %s255_s28 = scalar_lea.sflag [#allocation3], %s1431_s13  ;;  %s1440_s20 = int_to_ptr.vmem [resolvable:$true] %s267_s20 }
  0x1c   : > { %p1176_p2 = pneg %p1444_p13 }
  0x1f   : > { %s1438_s18 = scalar_lea.hbm %s1696_s1, %s978_s15  ;;  %s1179_s7 = scalar_lea.hbm %s1696_s1, 2048 }
  0x20   : > { %s1174_s30 = scalar_lea.hbm %s1438_s18, 512  ;;  %p1180_p4 = scmp.lt.u32.totalorder %s1438_s18, %s1696_s1 }
  0x21   : > { %p1175_p1 = scmp.ne.s32.totalorder %s1438_s18, %s1174_s30  ;;  %p1181_p6 = scmp.lt.u32.totalorder %s1179_s7, %s1174_s30 }
  0x22   : > { %p1183_p10 = scmp.lt.u32.totalorder %s1174_s30, %s1438_s18 }
  0x23   : > { %p1177_p3 = pnand %p1176_p2, %p1175_p1  ;;  %p1182_p7 = por %p1181_p6, %p1180_p4 }
  0x25   : > { %p1178_p5 = pneg %p1177_p3  ;;  %p1184_p12 = por %p1183_p10, %p1182_p7 }
  0x27   : > { %p1185_p0 = pnand %p1184_p12, %p1178_p5 }
  0x29   : > { %1188 = shalt.err (!%p1185_p0)
}
  0x2a   : > { %s1189_s17 = scalar_lea.vmem %s1440_s20, 512  ;;  %s1322_s19 = smov [#allocation2]  }
  0x2b   : > { %p1190_p1 = scmp.ne.s32.totalorder %s1440_s20, %s1189_s17  ;;  %s1194_s8 = sshll.u32 %s1322_s19, 4  ;;  %s1195_s8 = int_to_ptr.vmem [resolvable:$false] %s1194_s8 }
  0x2c   : > { %s1196_s14 = scalar_lea.vmem %s1195_s8, 1024  ;;  %p1197_p9 = scmp.lt.s32.totalorder %s1440_s20, %s1195_s8 }
  0x2d   : > { %p1192_p3 = pnand %p1190_p1, %p1176_p2  ;;  %p1198_p4 = scmp.lt.s32.totalorder %s1196_s14, %s1189_s17 }
  0x2f   : > { %p1193_p11 = pneg %p1192_p3  ;;  %p1199_p6 = por %p1198_p4, %p1197_p9 }
  0x31   : > { %p1200_p7 = pnand %p1199_p6, %p1193_p11 }
  0x33   : > { %1203 = shalt.err (!%p1200_p7)
}
  0x34   : > { %s1323_s30 = smov 128   ;;  %s1324_s7 = smov 8  }
  0x35   : > { %1051 = dma.hbm_to_vmem [thread:$0]  (!%p1444_p13), %s1438_s18, 512, %s1440_s20, %s255_s28, %s1323_s30, %s1323_s30, %s1324_s7  }
  0x36   : > { %p309_p0 = scmp.lt.s32.totalorder %s1320_s26, 5  ;;  %s1039_s15 = smul.u32 12, %s1431_s13 }
  0x37   : > { %p1698_p9 = scmp.ge.s32.totalorder %s1320_s26, 1  ;;  %s1040_s17 = smul.u32 192, %s1316_s25 }
  0x38   : > { %s294_s1 = scalar_lea.vmem [#allocation5], %s1039_s15  ;;  %s291_s18 = scalar_lea.sflag [#allocation6], %s1431_s13 }
  0x39   : > { %p1481_p11 = pnand %p1698_p9, %p309_p0  ;;  %s1489_s14 = scalar_lea.hbm %s1683_s3, %s1040_s17 }
  0x3a   : > { %s301_s29 = sshll.u32 %s294_s1, 4  ;;  %s1204_s20 = scalar_lea.hbm %s1489_s14, 192  ;;  %s1491_s29 = int_to_ptr.vmem [resolvable:$true] %s301_s29 }
  0x3b   : > { %p1205_p5 = scmp.ne.s32.totalorder %s1489_s14, %s1204_s20  ;;  %s1209_s7 = scalar_lea.hbm %s1683_s3, 768 }
  0x3c   : > { %p1210_p1 = scmp.lt.u32.totalorder %s1489_s14, %s1683_s3  ;;  %p1211_p3 = scmp.lt.u32.totalorder %s1209_s7, %s1204_s20 }
  0x3d   : > { %p1207_p10 = pnand %p1205_p5, %p1176_p2  ;;  %p1213_p6 = scmp.lt.u32.totalorder %s1204_s20, %s1489_s14 }
  0x3e   : > { %p1212_p4 = por %p1211_p3, %p1210_p1 }
  0x3f   : > { %p1208_p12 = pneg %p1207_p10 }
  0x40   : > { %p1214_p7 = por %p1213_p6, %p1212_p4 }
  0x42   : > { %p1215_p0 = pnand %p1214_p7, %p1208_p12 }
  0x44   : > { %1218 = shalt.err (!%p1215_p0)
}
  0x45   : > { %s1219_s1 = scalar_lea.vmem %s1491_s29, 192  ;;  %s1325_s15 = smov [#allocation5]  }
  0x46   : > { %p1220_p9 = scmp.ne.s32.totalorder %s1491_s29, %s1219_s1  ;;  %s1224_s8 = sshll.u32 %s1325_s15, 4  ;;  %s1225_s8 = int_to_ptr.vmem [resolvable:$false] %s1224_s8 }
  0x47   : > { %s1226_s28 = scalar_lea.vmem %s1225_s8, 384  ;;  %p1227_p8 = scmp.lt.s32.totalorder %s1491_s29, %s1225_s8 }
  0x48   : > { %p1222_p5 = pnand %p1220_p9, %p1176_p2  ;;  %p1228_p1 = scmp.lt.s32.totalorder %s1226_s28, %s1219_s1 }
  0x4a   : > { %p1223_p10 = pneg %p1222_p5  ;;  %p1229_p3 = por %p1228_p1, %p1227_p8 }
  0x4c   : > { %p1230_p4 = pnand %p1229_p3, %p1223_p10 }
  0x4e   : > { %1233 = shalt.err (!%p1230_p4)
}
  0x4f   : > { %s1326_s20 = smov 64   ;;  %s1327_s30 = smov 4  }
  0x50   : > { %1054 = dma.hbm_to_vmem [thread:$0]  (!%p1444_p13), %s1489_s14, 192, %s1491_s29, %s291_s18, %s1326_s20, %s1326_s20, %s1327_s30  }
  0x51   : > { %313 = sbr.rel (%p1481_p11) target bundleno = 859 (0x35b), region = 44  ;;  %s1522_s7 = sand.u32 (!%p1481_p11), 1, %s1304_s22  }
  0x52   : > { %s950_s17 = sshll.u32 (!%p1481_p11), %s1522_s7, 5  ;;  %s316_s19 = scalar_lea.sflag (!%p1481_p11), [#allocation3], %s1522_s7 }
  0x53   : > { %s319_s1 = scalar_lea.vmem (!%p1481_p11), [#allocation2], %s950_s17  ;;  %p1700_p8 = scmp.ne.s32.totalorder (!%p1481_p11), %s1693_s9, 0 }
  0x58   : > { %1287 = dma.done.wait (%p1700_p8), %s316_s19, 512  }
  0x59   : > { %1289 = vsyncadd (%p1700_p8), %s316_s19, 4294966784  ;;  %s1041_s29 = smul.u32 12, %s1522_s7  ;;  %s325_s13 = scalar_lea.sflag [#allocation6], %s1522_s7 }
  0x5b   : > { %s1532_s27 = scalar_lea.vmem [#allocation5], %s1041_s29 }
  0x5c   : > { %1291 = dma.done.wait (%p1700_p8), %s325_s13, 192  }
  0x5d   : > { %1293 = vsyncadd (%p1700_p8), %s325_s13, 4294967104  ;;  %v407_v0 = vld [vmem:[%s319_s1] sm:$0xff]  ;;  %v408_v1 = vld [vmem:[%s319_s1 + $0x8] sm:$0xff]  ;;  %s1328_s18 = smov 64   ;;  %p381_p13 = scmp.lt.s32.totalorder %s1312_s24, 3  ;;  %vm427_vm0 = vcmask 523264   ;;  %v554_v30 = vlaneseq }
  0x5e   : > { %v409_v2 = vld [vmem:[%s319_s1 + $0x10] sm:$0xff]  ;;  %v1116_v3 = vpack.i.bf16 %v408_v1, %v407_v0  ;;  %v410_v4 = vld [vmem:[%s319_s1 + $0x18] sm:$0xff]  ;;  %v1126_v5 = vld [vmem:[%s1684_s4] sm:$0xff]   ;;  %vm656_vm3 = vcmask 195584   ;;  %s951_s29 = sshll.u32 %s1522_s7, 6  ;;  %s981_s16 = sshll.u32 %s1312_s24, 10 }
  0x5f   : > { %v1121_v6 = vpack.i.bf16 %v410_v4, %v409_v2  ;;  %v1127_v7 = vld [vmem:[%s1684_s4 + $0x8] sm:$0xff]   ;;  %1003 = vmatprep.subr.bf16.mxu0 %v1126_v5  ;;  %v1128_v8 = vld [vmem:[%s1684_s4 + $0x10] sm:$0xff]   ;;  %v1129_v9 = vld [vmem:[%s1684_s4 + $0x18] sm:$0xff]   ;;  %s1564_s15 = scalar_select %p381_p13, %s1312_s24, 3  ;;  %v1572_v31 = vand.u32 127, %v554_v30 }
  0x60   : > { %1117 = vrot.lane.b32.xlu0 %v1116_v3, %s1328_s18  ;;  %1004 = vmatpush3.bf16.msra.mxu0 %v1126_v5  ;;  %v1130_v10 = vld [vmem:[%s1684_s4 + $0x20] sm:$0xff]   ;;  %v1131_v11 = vld [vmem:[%s1684_s4 + $0x28] sm:$0xff]   ;;  %v1132_v12 = vld [vmem:[%s1684_s4 + $0x30] sm:$0xff]   ;;  %s1608_s13 = scalar_lea.vmem [#allocation7], %s951_s29  ;;  %s779_s24 = scalar_lea.sflag [#allocation4], %s1522_s7 }
  0x61   : > { %1005 = vmatprep.subr.bf16.mxu0 %v1127_v7  ;;  %v1133_v13 = vld [vmem:[%s1684_s4 + $0x38] sm:$0xff]   ;;  %s979_s8 = sshll.u32 %s1564_s15, 5  ;;  %v956_v32 = vld [vmem:[%s1685_s5] ss:$0 sm:$0xff]  ;;  %vm556_vm1 = vcmp.eq.s32.totalorder %v1572_v31, 48  ;;  %vm593_vm2 = vcmp.lt.s32.totalorder %v1572_v31, 48 }
  0x62   : > { %s388_s20 = scalar_lea.vmem %s1680_s0, %s979_s8  ;;  %v983_v49 = vld [vmem:[%s1532_s27] sm:$0xff]   ;;  %v652_v50 = vld [vmem:[%s1532_s27 + $0x8] sm:$0xf]  ;;  %s399_s1 = scalar_lea.vmem %s1682_s2, %s979_s8 }
  0x63   : > { %v403_v15 = vld [vmem:[%s388_s20] sm:$0xff]  ;;  %v404_v16 = vld [vmem:[%s388_s20 + $0x8] sm:$0xff]  ;;  %v405_v23 = vld [vmem:[%s388_s20 + $0x10] sm:$0xff]  ;;  %1036 = vmatprep.subr.bf16.mxu1 %v983_v49  ;;  %v655_v51 = vunpack.c.l.bf16 %v652_v50  ;;  %s795_s14 = sshll.u32 %s1608_s13, 4  ;;  %s1628_s8 = scalar_lea.hbm %s1686_s6, %s981_s16  ;;  %s1630_s14 = int_to_ptr.vmem [resolvable:$true] %s795_s14 }
  0x64   : > { %1122 = vrot.lane.b32.xlu0 %v1121_v6, %s1328_s18  ;;  %1006 = vmatpush3.bf16.msra.mxu0 %v1127_v7  ;;  %v406_v24 = vld [vmem:[%s388_s20 + $0x18] sm:$0xff]  ;;  %s1234_s9 = scalar_lea.vmem %s1630_s14, 1024  ;;  %p1701_p11 = scmp.ne.s32.totalorder %s1694_s10, 0 }
  0x65   : > { %1007 = vmatprep.subr.bf16.mxu0 %v1128_v8  ;;  %1038 = vmatpush3.bf16.msra.mxu1 %v983_v49  ;;  %p1235_p2 = scmp.ne.s32.totalorder %s1630_s14, %s1234_s9  ;;  %s1329_s28 = smov [#allocation7]  }
  0x66   : > { %1027 = vmatprep.subr.mxu1 %v655_v51  ;;  %s1238_s20 = sshll.u32 %s1329_s28, 4  ;;  %s1239_s20 = int_to_ptr.vmem [resolvable:$false] %s1238_s20 }
  0x67   : > { %p1236_p12 = pnand %p1235_p2, %p1701_p11  ;;  %s1240_s30 = scalar_lea.vmem %s1239_s20, 2048 }
  0x68   : > { %1008 = vmatpush3.bf16.msra.mxu0 %v1128_v8  ;;  %p1241_p7 = scmp.lt.s32.totalorder %s1630_s14, %s1239_s20  ;;  %p1242_p0 = scmp.lt.s32.totalorder %s1240_s30, %s1234_s9 }
  0x69   : > { %1009 = vmatprep.subr.bf16.mxu0 %v1129_v9  ;;  %1028 = vmatpush3.msra.mxu1 %v655_v51  ;;  %p1237_p6 = pneg %p1236_p12 }
  0x6a   : > { %p1243_p9 = por %p1242_p0, %p1241_p7 }
  0x6c   : > { %1010 = vmatpush3.bf16.msra.mxu0 %v1129_v9  ;;  %p1244_p5 = pnand %p1243_p9, %p1237_p6 }
  0x6d   : > { %1011 = vmatprep.subr.bf16.mxu0 %v1130_v10 }
  0x70   : > { %1012 = vmatpush3.bf16.msra.mxu0 %v1130_v10 }
  0x71   : > { %1013 = vmatprep.subr.bf16.mxu0 %v1131_v11 }
  0x74   : > { %1014 = vmatpush3.bf16.msra.mxu0 %v1131_v11 }
  0x75   : > { %1015 = vmatprep.subr.bf16.mxu0 %v1132_v12 }
  0x78   : > { %1016 = vmatpush3.bf16.msra.mxu0 %v1132_v12 }
  0x79   : > { %1017 = vmatprep.subr.bf16.mxu0 %v1133_v13 }
  0x7c   : > { %1018 = vmatpush3.bf16.msra.mxu0 %v1133_v13 }
  0xd2   : > { %v1118_v14 = vpop.permute.xlu0 %1117 }
  0xd3   : > { %v1120_v17 = vunpack.i.h.bf16 %v1118_v14  ;;  %v1119_v18 = vunpack.i.l.bf16 %v1118_v14  ;;  %v642_v14 = vld [vmem:[%s399_s1] sm:$0xff] }
  0xd5   : > { %v428_v19 = vsel %vm427_vm0, %v403_v15, %v1119_v18  ;;  %v429_v20 = vsel %vm427_vm0, %v404_v16, %v1120_v17 }
  0xd6   : > { %v1123_v21 = vpop.permute.xlu0 %1122  ;;  %v432_v22 = vpack.c.bf16 %v429_v20, %v428_v19  ;;  %v643_v20 = vld [vmem:[%s399_s1 + $0x8] sm:$0xff] }
  0xd7   : > { %v1125_v25 = vunpack.i.h.bf16 %v1123_v21  ;;  %v1124_v26 = vunpack.i.l.bf16 %v1123_v21 }
  0xd8   : > { %1019 = vmatprep.mubr.bf16.mxu0 %v432_v22  ;;  %v644_v22 = vld [vmem:[%s399_s1 + $0x10] sm:$0xff] }
  0xd9   : > { %v430_v27 = vsel %vm427_vm0, %v405_v23, %v1124_v26  ;;  %v431_v28 = vsel %vm427_vm0, %v406_v24, %v1125_v25  ;;  %v645_v26 = vld [vmem:[%s399_s1 + $0x18] sm:$0xff] }
  0xda   : > { %v433_v29 = vpack.c.bf16 %v431_v28, %v430_v27 }
  0xdc   : > { %1020 = vmatmul.mubr.bf16.vlgmr.msra.gmra.mrb[0].mxu0 %v433_v29 }
 0x1af   : > { %v1021_v33 = vpop.f32.mrb[0].mxu0 }
 0x1b0   : > { %v548_v34 = vadd.f32 %v1021_v33, %v956_v32  ;;  %v539_v35 = vpop.f32.mrb[1].mxu0 }
 0x1b1   : > { %v540_v36 = vadd.f32 %v956_v32, %v539_v35  ;;  %v1022_v37 = vpop.f32.mrb[2].mxu0 }
 0x1b2   : > { %v542_v38 = vpop.f32.mrb[3].mxu0  ;;  %v559_v39 = vsel %vm556_vm1, %v548_v34, 0.0  ;;  %v551_v42 = vadd.f32 %v1022_v37, %v956_v32  ;;  %v596_v46 = vsel %vm593_vm2, %v548_v34, -1e+30 }
 0x1b3   : > { %v543_v40 = vadd.f32 %v956_v32, %v542_v38  ;;  %565 = vadd.xlane.f32.xlu0 %v559_v39  ;;  %v557_v41 = vsel %vm556_vm1, %v540_v36, 0.0  ;;  %v594_v45 = vsel %vm593_vm2, %v540_v36, -1e+30 }
 0x1b4   : > { %561 = vadd.xlane.f32.xlu1 %v557_v41  ;;  %v560_v44 = vsel %vm556_vm1, %v551_v42, 0.0  ;;  %v597_v48 = vsel %vm593_vm2, %v551_v42, -1e+30 }
 0x1b5   : > { %v558_v43 = vsel %vm556_vm1, %v543_v40, 0.0  ;;  %v595_v47 = vsel %vm593_vm2, %v543_v40, -1e+30 }
 0x1b8   : > { %563 = vadd.xlane.f32.xlu1 %v558_v43 }
 0x1bc   : > { %567 = vadd.xlane.f32.xlu1 %v560_v44 }
 0x1c0   : > { %598 = vmax.xlane.f32.xlu1 %v594_v45 }
 0x1c4   : > { %602 = vmax.xlane.f32.xlu1 %v596_v46 }
 0x1c8   : > { %600 = vmax.xlane.f32.xlu1 %v595_v47 }
 0x1cc   : > { %604 = vmax.xlane.f32.xlu1 %v597_v48 }
 0x240   : > { %v566_v52 = vpop.xlane.xlu0 %565 }
 0x241   : > { %v967_v53 = vmul.f32 -1.442695, %v566_v52  ;;  %v562_v54 = vpop.xlane.xlu1 %561 }
 0x242   : > { %v965_v55 = vmul.f32 -1.442695, %v562_v54 }
 0x243   : > { %1134 = vpow2.f32 %v967_v53 }
 0x244   : > { %1136 = vpow2.f32 %v965_v55 }
 0x245   : > { %v564_v56 = vpop.xlane.xlu1 %563 }
 0x246   : > { %v966_v57 = vmul.f32 -1.442695, %v564_v56 }
 0x248   : > { %1138 = vpow2.f32 %v966_v57 }
 0x249   : > { %v568_v58 = vpop.xlane.xlu1 %567 }
 0x24a   : > { %v968_v59 = vmul.f32 -1.442695, %v568_v58 }
 0x24c   : > { %1140 = vpow2.f32 %v968_v59 }
 0x24d   : > { %v1135_v60 = vpop.eup %1134  ;;  %v599_v61 = vpop.xlane.xlu1 %598 }
 0x24e   : > { %v1137_v62 = vpop.eup %1136  ;;  %v1589_v63 = vsub.f32 %v594_v45, %v599_v61  ;;  %v583_v1 = vadd.f32 1.0, %v1135_v60 }
 0x24f   : > { %v581_v0 = vadd.f32 1.0, %v1137_v62 }
 0x250   : > { %v610_v2 = vmul.f32 1.442695, %v1589_v63 }
 0x251   : > { %1142 = vrcp.f32 %v581_v0  ;;  %v603_v3 = vpop.xlane.xlu1 %602 }
 0x252   : > { %v1139_v4 = vpop.eup %1138  ;;  %1144 = vpow2.f32 %v610_v2  ;;  %v1592_v6 = vsub.f32 %v596_v46, %v603_v3 }
 0x253   : > { %v582_v5 = vadd.f32 1.0, %v1139_v4  ;;  %1146 = vrcp.f32 %v583_v1 }
 0x254   : > { %v614_v12 = vmul.f32 1.442695, %v1592_v6 }
 0x255   : > { %1148 = vrcp.f32 %v582_v5  ;;  %v601_v7 = vpop.xlane.xlu1 %600 }
 0x256   : > { %v1141_v8 = vpop.eup %1140  ;;  %v607_v9 = vsub.f32 %v595_v47, %v601_v7 }
 0x257   : > { %v584_v10 = vadd.f32 1.0, %v1141_v8 }
 0x258   : > { %v612_v11 = vmul.f32 1.442695, %v607_v9 }
 0x259   : > { %1150 = vrcp.f32 %v584_v10  ;;  %v605_v13 = vpop.xlane.xlu1 %604 }
 0x25a   : > { %1152 = vpow2.f32 %v612_v11  ;;  %v609_v15 = vsub.f32 %v597_v48, %v605_v13 }
 0x25b   : > { %v1143_v16 = vpop.eup %1142  ;;  %1154 = vpow2.f32 %v614_v12 }
 0x25c   : > { %v1145_v17 = vpop.eup %1144  ;;  %v616_v18 = vmul.f32 1.442695, %v609_v15  ;;  %v646_v19 = vmul.f32 %v1143_v16, %v642_v14 }
 0x25d   : > { %618 = vadd.xlane.f32.xlu1 %v1145_v17  ;;  %v1147_v21 = vpop.eup %1146 }
 0x25e   : > { %1156 = vpow2.f32 %v616_v18  ;;  %1029 = vmatprep.mubr.msk.f32.mxu1 %vm656_vm3, %v646_v19  ;;  %v648_v25 = vmul.f32 %v1147_v21, %v644_v22 }
 0x25f   : > { %v1149_v23 = vpop.eup %1148 }
 0x260   : > { %v647_v24 = vmul.f32 %v1149_v23, %v643_v20 }
 0x262   : > { %1030 = vmatmul.mubr.msk.f32.vlgmr.msra.gmra.mrb[0].mxu1 %vm656_vm3, %v647_v24 }
 0x263   : > { %v1151_v27 = vpop.eup %1150  ;;  %1032 = vmatprep.mubr.msk.f32.mxu1 %vm656_vm3, %v648_v25 }
 0x264   : > { %v1153_v28 = vpop.eup %1152  ;;  %v649_v29 = vmul.f32 %v1151_v27, %v645_v26 }
 0x265   : > { %620 = vadd.xlane.f32.xlu1 %v1153_v28  ;;  %v1155_v30 = vpop.eup %1154 }
 0x266   : > { %1033 = vmatmul.mubr.msk.f32.gmra.mrb[2].mxu1 %vm656_vm3, %v649_v29 }
 0x268   : > { %v1157_v32 = vpop.eup %1156 }
 0x269   : > { %622 = vadd.xlane.f32.xlu1 %v1155_v30  ;;  %624 = vadd.xlane.f32.xlu0 %v1157_v32 }
 0x2ea   : > { %v619_v33 = vpop.xlane.xlu1 %618 }
 0x2eb   : > { %1158 = vlog2.f32 %v619_v33 }
 0x2f2   : > { %v621_v34 = vpop.xlane.xlu1 %620 }
 0x2f3   : > { %1160 = vlog2.f32 %v621_v34 }
 0x2f5   : > { %v1159_v35 = vpop.eup %1158 }
 0x2f6   : > { %v627_v36 = vmul.f32 0.6931472, %v1159_v35  ;;  %v625_v37 = vpop.xlane.xlu0 %624  ;;  %v623_v38 = vpop.xlane.xlu1 %622 }
 0x2f7   : > { %1162 = vlog2.f32 %v625_v37 }
 0x2f8   : > { %v634_v39 = vsub.f32 %v1589_v63, %v627_v36  ;;  %1164 = vlog2.f32 %v623_v38 }
 0x2fa   : > { %v638_v40 = vsel %vm556_vm1, %v1143_v16, %v634_v39 }
 0x2fb   : > { %770 = vst [vmem:[%s1608_s13] sm:$0xff] %v638_v40 }
 0x2fd   : > { %v1161_v41 = vpop.eup %1160 }
 0x2fe   : > { %v629_v42 = vmul.f32 0.6931472, %v1161_v41 }
 0x300   : > { %v635_v43 = vsub.f32 %v607_v9, %v629_v42 }
 0x301   : > { %v1163_v44 = vpop.eup %1162 }
 0x302   : > { %v1165_v45 = vpop.eup %1164  ;;  %v639_v46 = vsel %vm556_vm1, %v1149_v23, %v635_v43  ;;  %v633_v47 = vmul.f32 0.6931472, %v1163_v44 }
 0x303   : > { %772 = vst [vmem:[%s1608_s13 + $0x10] sm:$0xff] %v639_v46  ;;  %v631_v48 = vmul.f32 0.6931472, %v1165_v45 }
 0x304   : > { %v637_v49 = vsub.f32 %v609_v15, %v633_v47 }
 0x305   : > { %v636_v50 = vsub.f32 %v1592_v6, %v631_v48 }
 0x306   : > { %v641_v51 = vsel %vm556_vm1, %v1151_v27, %v637_v49 }
 0x307   : > { %776 = vst [vmem:[%s1608_s13 + $0x30] sm:$0xff] %v641_v51  ;;  %v640_v52 = vsel %vm556_vm1, %v1147_v21, %v636_v50 }
 0x308   : > { %774 = vst [vmem:[%s1608_s13 + $0x20] sm:$0xff] %v640_v52 }
 0x335   : > { %v1031_v53 = vpop.f32.mrb[0].mxu1 }
 0x336   : > { %v755_v54 = vmax.f32 %v1031_v53, 1e-06  ;;  %v735_v55 = vpop.f32.mrb[1].mxu1 }
 0x337   : > { %v754_v56 = vmax.f32 %v735_v55, 1e-06 }
 0x338   : > { %v759_v57 = vmin.f32 %v755_v54, 0.999999 }
 0x339   : > { %v758_v58 = vmin.f32 %v754_v56, 0.999999  ;;  %v1034_v59 = vpop.f32.mrb[2].mxu1 }
 0x33a   : > { %1166 = vlog2.f32 %v759_v57  ;;  %v757_v60 = vmax.f32 %v1034_v59, 1e-06  ;;  %v745_v61 = vpop.f32.mrb[3].mxu1 }
 0x33b   : > { %1168 = vlog2.f32 %v758_v58  ;;  %v756_v62 = vmax.f32 %v745_v61, 1e-06 }
 0x33c   : > { %v761_v63 = vmin.f32 %v757_v60, 0.999999 }
 0x33d   : > { %v760_v31 = vmin.f32 %v756_v62, 0.999999 }
 0x33e   : > { %1170 = vlog2.f32 %v761_v63 }
 0x33f   : > { %1172 = vlog2.f32 %v760_v31 }
 0x344   : > { %v1167_v0 = vpop.eup %1166 }
 0x345   : > { %v1169_v1 = vpop.eup %1168  ;;  %v765_v2 = vmul.f32 0.6931472, %v1167_v0 }
 0x346   : > { %v763_v3 = vmul.f32 0.6931472, %v1169_v1 }
 0x347   : > { %773 = vst [vmem:[%s1608_s13 + $0x18] sm:$0xff] %v765_v2 }
 0x348   : > { %v1171_v4 = vpop.eup %1170  ;;  %771 = vst [vmem:[%s1608_s13 + $0x8] sm:$0xff] %v763_v3 }
 0x349   : > { %v1173_v5 = vpop.eup %1172  ;;  %v769_v6 = vmul.f32 0.6931472, %v1171_v4 }
 0x34a   : > { %v767_v7 = vmul.f32 0.6931472, %v1173_v5 }
 0x34b   : > { %777 = vst [vmem:[%s1608_s13 + $0x38] sm:$0xff] %v769_v6 }
 0x34c   : > { %775 = vst [vmem:[%s1608_s13 + $0x28] sm:$0xff] %v767_v7 }
 0x34d   : > { %1247 = shalt.err (!%p1244_p5)
}
 0x34e   : > { %s1248_s17 = scalar_lea.hbm %s1628_s8, 1024  ;;  %s1252_s1 = scalar_lea.hbm %s1686_s6, 4096 }
 0x34f   : > { %p1249_p10 = scmp.ne.s32.totalorder %s1628_s8, %s1248_s17  ;;  %p1253_p4 = scmp.lt.u32.totalorder %s1628_s8, %s1686_s6 }
 0x350   : > { %p1254_p8 = scmp.lt.u32.totalorder %s1252_s1, %s1248_s17  ;;  %p1256_p2 = scmp.lt.u32.totalorder %s1248_s17, %s1628_s8 }
 0x351   : > { %p1250_p1 = pnand %p1249_p10, %p1701_p11 }
 0x352   : > { %p1255_p13 = por %p1254_p8, %p1253_p4 }
 0x353   : > { %p1251_p3 = pneg %p1250_p1 }
 0x354   : > { %p1257_p12 = por %p1256_p2, %p1255_p13 }
 0x356   : > { %p1258_p6 = pnand %p1257_p12, %p1251_p3 }
 0x358   : > { %1261 = shalt.err (!%p1258_p6)
}
 0x359   : > { %s1330_s16 = smov 256   ;;  %s1331_s18 = smov 16  }
 0x35a   : > { %1046 = dma.vmem_to_hbm [thread:$0]  (%p1701_p11), %s1630_s14, 1024, %s1628_s8, %s779_s24, %s1330_s16, %s1330_s16, %s1331_s18  }
 0x35b PF: > { %p1060_p7 = scmp.ge.s32.totalorder %s1320_s26, 2  ;;  %s810_s15 = sand.u32 1, %s1300_s21  }
 0x35c   : > { %p1702_p0 = scmp.ne.s32.totalorder %s1695_s12, 0  ;;  %s811_s9 = scalar_lea.sflag [#allocation4], %s810_s15 }
 0x35e   : > { %p1056_p9 = pnand %p1060_p7, %p1702_p0 }
 0x360   : > { %1295 = dma.done.wait (!%p1056_p9), %s811_s9, 1024  }
 0x361   : > { %1297 = vsyncadd (!%p1056_p9), %s811_s9, 4294966272  ;;  %s25_s26 = sadd.s32 1, %s1320_s26   ;;  %s1703_s10 = sld [smem:[#allocation11_spill]] }
 0x362   : > { %p22_p5 = scmp.ge.s32.totalorder %s25_s26, 6   ;;  %s1704_s21 = smov %s1304_s22 }
 0x363   : > { %s1705_s22 = smov %s1308_s23  ;;  %s1706_s23 = smov %s1423_s11 }
 0x364   : > { %s1707_s24 = smov %s1316_s25  ;;  %24 = sbr.rel (!%p22_p5) target bundleno = 10 (0xa), region = 108 }
 0x367   : > { %s1708_s25 = smov %s1703_s10 }
 0x36b   :  { %816 = vsyncpa [#allocation3], 1 }
 0x36c   :  { %818 = vsyncpa [#allocation3 + $0x1], 1 }
 0x36d   :  { %819 = vsyncpa [#allocation6], 1 }
 0x36e   :  { %821 = vsyncpa [#allocation6 + $0x1], 1 }
 0x36f   :  { %822 = vsyncpa [#allocation4], 1 }
 0x370   :  { %824 = vsyncpa [#allocation4 + $0x1], 1 }

</bundles_post_ra>
